<compile_context>
chip_gen: v7x
topology: tpu7x:2x2x1
jax: 0.10.0
libtpu: 0.0.40
codegen_flags: <defaults>
</compile_context>

<pallas_src>
import functools

import jax
import jax.numpy as jnp
from jax import lax
from jax.experimental import pallas as pl
from jax.experimental.pallas import tpu as pltpu


def _round_up(x, m):
    return (x + m - 1) // m * m


def _matmul_bias_leaky_kernel(x_ref, w_ref, b_ref, o_ref, acc_ref, *, alpha):
    """One (TM, TN) output tile; K-reduction over grid axis 2.

    x_ref: (TM, TK) bf16   w_ref: (TK, TN) bf16   b_ref: (1, TN) f32
    o_ref: (TM, TN) out dtype   acc_ref: (TM, TN) f32 scratch
    """
    k = pl.program_id(2)

    @pl.when(k == 0)
    def _():
        acc_ref[...] = jnp.zeros_like(acc_ref)

    acc_ref[...] += jnp.dot(x_ref[...], w_ref[...],
                            preferred_element_type=jnp.float32)

    @pl.when(k == pl.num_programs(2) - 1)
    def _():
        y = acc_ref[...] + b_ref[...]          # folded-BN bias (f32 epilogue)
        y = jnp.maximum(y, alpha * y)          # LeakyReLU(alpha)
        o_ref[...] = y.astype(o_ref.dtype)


def matmul_bias_leaky(x, w, b, *, alpha=0.1, out_dtype=jnp.bfloat16,
                      tm=256, tn_max=256, tk_max=512):
    """(M, K) @ (K, Cout) + b then LeakyReLU, bf16 operands / f32 accumulate."""
    M, K = x.shape
    Kw, Cout = w.shape
    assert K == Kw

    tm = min(tm, _round_up(M, 8))
    mp = _round_up(M, tm)
    tk = min(tk_max, _round_up(K, 128))
    kp = _round_up(K, tk)
    cout_p = _round_up(Cout, 128)
    tn = tn_max if cout_p % tn_max == 0 else 128

    xp = jnp.pad(x.astype(jnp.bfloat16), ((0, mp - M), (0, kp - K)))
    wp = jnp.pad(w.astype(jnp.bfloat16), ((0, kp - K), (0, cout_p - Cout)))
    bp = jnp.pad(b.astype(jnp.float32), ((0, 0), (0, cout_p - Cout)))

    grid = (mp // tm, cout_p // tn, kp // tk)
    out = pl.pallas_call(
        functools.partial(_matmul_bias_leaky_kernel, alpha=alpha),
        out_shape=jax.ShapeDtypeStruct((mp, cout_p), out_dtype),
        grid=grid,
        in_specs=[
            pl.BlockSpec((tm, tk), lambda i, j, k: (i, k)),
            pl.BlockSpec((tk, tn), lambda i, j, k: (k, j)),
            pl.BlockSpec((1, tn), lambda i, j, k: (0, j)),
        ],
        out_specs=pl.BlockSpec((tm, tn), lambda i, j, k: (i, j)),
        scratch_shapes=[pltpu.VMEM((tm, tn), jnp.float32)],
        compiler_params=pltpu.CompilerParams(
            dimension_semantics=("parallel", "parallel", "arbitrary"),
            vmem_limit_bytes=48 * 1024 * 1024),
    )(xp, wp, bp)
    return out[:M, :Cout]


def conv_bn_leaky_nhwc(x_nhwc, w_hwio, bn, *, ksize, pad, alpha=0.1,
                       out_dtype=jnp.bfloat16):
    """Conv2d(stride=1, no bias) + folded BN + LeakyReLU, NHWC in/out."""
    gamma, beta, mean, var, eps = bn
    N, H, W, Cin = x_nhwc.shape
    Cout = w_hwio.shape[-1]

    # Fold BN (eval mode) into conv weight / bias (in f32, then cast to bf16).
    scale = gamma / jnp.sqrt(var + eps)                 # (Cout,)
    w_f = (w_hwio * scale).astype(jnp.bfloat16)         # (KH, KW, Cin, Cout)
    b_f = (beta - mean * scale)[None, :]                # (1, Cout) f32

    if ksize == 1:
        x2d = x_nhwc.reshape(N * H * W, Cin)            # 1x1 conv: no im2col
        w2d = w_f.reshape(Cin, Cout)
    else:
        xp = jnp.pad(x_nhwc, ((0, 0), (pad, pad), (pad, pad), (0, 0)))
        cols = [xp[:, kh:kh + H, kw:kw + W, :]
                for kh in range(ksize) for kw in range(ksize)]
        x2d = jnp.concatenate(cols, axis=-1).reshape(
            N * H * W, ksize * ksize * Cin)
        w2d = w_f.reshape(ksize * ksize * Cin, Cout)

    y2d = matmul_bias_leaky(x2d, w2d, b_f, alpha=alpha, out_dtype=out_dtype)
    return y2d.reshape(N, H, W, Cout)


class PPYOLODetBlockPallas:
    """Mirrors PPYOLODetBlock with the standard PP-YOLO cfg:
         conv0 1x1 ch_in->c, conv1 3x3 c->2c, conv2 1x1 2c->c,
         conv3 3x3 c->2c, route 1x1 2c->c, tip(last) 3x3 c->2c.
       forward: route = conv_module(x);  tip = tip(route);  return (route, tip)
    """

    def __init__(self, ch_in, channel, key):
        specs = [
            ("conv0", ch_in,       channel,     1, 0),
            ("conv1", channel,     channel * 2, 3, 1),
            ("conv2", channel * 2, channel,     1, 0),
            ("conv3", channel,     channel * 2, 3, 1),
            ("route", channel * 2, channel,     1, 0),
            ("tip",   channel,     channel * 2, 3, 1),
        ]
        self.layers = []
        for name, cin, cout, k, p in specs:
            key, kw, kg, kb, km, kv = jax.random.split(key, 6)
            w = 0.1 * jax.random.normal(kw, (k, k, cin, cout), jnp.float32)
            gamma = 1.0 + 0.1 * jax.random.normal(kg, (cout,), jnp.float32)
            beta = 0.1 * jax.random.normal(kb, (cout,), jnp.float32)
            mean = 0.1 * jax.random.normal(km, (cout,), jnp.float32)
            var = 1.0 + 0.1 * jnp.abs(jax.random.normal(kv, (cout,), jnp.float32))
            self.layers.append((name, w, (gamma, beta, mean, var, 1e-5), k, p))

    def __call__(self, x_nchw):
        out_dtype = x_nchw.dtype
        # One NCHW -> NHWC transpose at entry; internal chain stays NHWC bf16.
        h = jnp.transpose(x_nchw, (0, 2, 3, 1)).astype(jnp.bfloat16)
        for _, w, bn, k, p in self.layers[:-1]:
            h = conv_bn_leaky_nhwc(h, w, bn, ksize=k, pad=p,
                                   out_dtype=jnp.bfloat16)
        route_nhwc = h
        _, w, bn, k, p = self.layers[-1]
        tip_nhwc = conv_bn_leaky_nhwc(route_nhwc, w, bn, ksize=k, pad=p,
                                      out_dtype=jnp.bfloat16)
        route = jnp.transpose(route_nhwc, (0, 3, 1, 2)).astype(out_dtype)
        tip = jnp.transpose(tip_nhwc, (0, 3, 1, 2)).astype(out_dtype)
        return route, tip


def _ref_conv_bn_leaky(x_nchw, w_hwio, bn, ksize, pad, alpha=0.1):
    gamma, beta, mean, var, eps = bn
    y = lax.conv_general_dilated(
        x_nchw, w_hwio, window_strides=(1, 1),
        padding=[(pad, pad), (pad, pad)],
        dimension_numbers=("NCHW", "HWIO", "NCHW"),
        precision=jax.lax.Precision.HIGHEST)
    scale = gamma / jnp.sqrt(var + eps)
    y = y * scale[None, :, None, None] + (beta - mean * scale)[None, :, None, None]
    return jnp.where(y > 0, y, alpha * y)


if __name__ == "__main__":
    key = jax.random.PRNGKey(0)
    kx, kp = jax.random.split(key)

    N, ch_in, H, W = 2, 16, 16, 16
    channel = 8
    x = jax.random.normal(kx, (N, ch_in, H, W), jnp.float32)

    block = PPYOLODetBlockPallas(ch_in, channel, kp)
    fwd = jax.jit(block.__call__)
    route, tip = fwd(x)
    jax.block_until_ready((route, tip))

    # Pure-JAX f32 reference chain for sanity checking (kernel runs bf16 operands
    # with f32 accumulation, hence the relaxed tolerances).
    r = x
    for _, w, bn, k, p in block.layers[:-1]:
        r = _ref_conv_bn_leaky(r, w, bn, k, p)
    _, w, bn, k, p = block.layers[-1]
    t = _ref_conv_bn_leaky(r, w, bn, k, p)

    assert route.shape == (N, channel, H, W)
    assert tip.shape == (N, channel * 2, H, W)
    assert jnp.allclose(route, r, atol=5e-2, rtol=5e-2)
    assert jnp.allclose(tip, t, atol=5e-2, rtol=5e-2)

    print("KERNEL_OK")
</pallas_src>

<mosaic_0001>
module attributes {stable_mosaic.version = 11 : i64} {
  func.func @_matmul_bias_leaky_kernel(%arg0: i32, %arg1: i32, %arg2: i32, %arg3: memref<256x128xbf16, #tpu.memory_space<vmem>>, %arg4: memref<128x128xbf16, #tpu.memory_space<vmem>>, %arg5: memref<1x128xf32, #tpu.memory_space<vmem>>, %arg6: memref<256x128xbf16, #tpu.memory_space<vmem>>, %arg7: memref<256x128xf32, #tpu.memory_space<vmem>>) attributes {dimension_semantics = [#tpu.dimension_semantics<parallel>, #tpu.dimension_semantics<parallel>, #tpu.dimension_semantics<arbitrary>], iteration_bounds = array<i64: 2, 1, 1>, scalar_prefetch = 0 : i64, scratch_operands = 1 : i64, tpu.core_type = #tpu.core_type<tc>, window_params = [{transform_indices = @transform_0, window_bounds = array<i64: 256, 128>}, {transform_indices = @transform_1, window_bounds = array<i64: 128, 128>}, {transform_indices = @transform_2, window_bounds = array<i64: 1, 128>}, {transform_indices = @transform_3, window_bounds = array<i64: 256, 128>}]} {
    %c0_i32 = arith.constant 0 : i32
    %0 = arith.cmpi eq, %arg2, %c0_i32 : i32
    %1 = arith.extui %0 : i1 to i32
    %c0_i32_0 = arith.constant 0 : i32
    %2 = arith.cmpi ne, %1, %c0_i32_0 : i32
    scf.if %2 {
      %cst_10 = arith.constant 0.000000e+00 : f32
      %12 = vector.broadcast %cst_10 : f32 to vector<256x128xf32>
      %c0_11 = arith.constant 0 : index
      %c0_12 = arith.constant 0 : index
      %13 = vector.load %arg7[%c0_11, %c0_12] : memref<256x128xf32, #tpu.memory_space<vmem>>, vector<256x128xf32>
      tpu.vector_store %arg7[%c0_11, %c0_12], %12 {strides = array<i32>} : memref<256x128xf32, #tpu.memory_space<vmem>>, vector<256x128xf32>,
    } else {
    }
    %c0 = arith.constant 0 : index
    %c0_1 = arith.constant 0 : index
    %3 = vector.load %arg7[%c0, %c0_1] : memref<256x128xf32, #tpu.memory_space<vmem>>, vector<256x128xf32>
    %c0_2 = arith.constant 0 : index
    %c0_3 = arith.constant 0 : index
    %4 = vector.load %arg3[%c0_2, %c0_3] : memref<256x128xbf16, #tpu.memory_space<vmem>>, vector<256x128xbf16>
    %c0_4 = arith.constant 0 : index
    %c0_5 = arith.constant 0 : index
    %5 = vector.load %arg4[%c0_4, %c0_5] : memref<128x128xbf16, #tpu.memory_space<vmem>>, vector<128x128xbf16>
    %cst = arith.constant dense<0.000000e+00> : vector<256x128xf32>
    %6 = tpu.matmul %4, %5, %cst {dimension_numbers = #tpu.dot_dimension_numbers<[1], [0], [0], [1], [0, 0, 1, 1], [], []>} : vector<256x128xbf16>, vector<128x128xbf16>, vector<256x128xf32> -> vector<256x128xf32>
    %7 = arith.addf %3, %6 : vector<256x128xf32>
    %c0_6 = arith.constant 0 : index
    %c0_7 = arith.constant 0 : index
    %8 = vector.load %arg7[%c0_6, %c0_7] : memref<256x128xf32, #tpu.memory_space<vmem>>, vector<256x128xf32>
    tpu.vector_store %arg7[%c0_6, %c0_7], %7 {strides = array<i32>} : memref<256x128xf32, #tpu.memory_space<vmem>>, vector<256x128xf32>,
    %c0_i32_8 = arith.constant 0 : i32
    %9 = arith.cmpi eq, %arg2, %c0_i32_8 : i32
    %10 = arith.extui %9 : i1 to i32
    %c0_i32_9 = arith.constant 0 : i32
    %11 = arith.cmpi ne, %10, %c0_i32_9 : i32
    scf.if %11 {
      %c0_10 = arith.constant 0 : index
      %c0_11 = arith.constant 0 : index
      %12 = vector.load %arg7[%c0_10, %c0_11] : memref<256x128xf32, #tpu.memory_space<vmem>>, vector<256x128xf32>
      %c0_12 = arith.constant 0 : index
      %c0_13 = arith.constant 0 : index
      %13 = vector.load %arg5[%c0_12, %c0_13] : memref<1x128xf32, #tpu.memory_space<vmem>>, vector<1x128xf32>
      %14 = vector.broadcast %13 : vector<1x128xf32> to vector<256x128xf32>
      %15 = arith.addf %12, %14 : vector<256x128xf32>
      %cst_14 = arith.constant 1.000000e-01 : f32
      %16 = vector.broadcast %cst_14 : f32 to vector<256x128xf32>
      %17 = arith.mulf %16, %15 : vector<256x128xf32>
      %18 = arith.maximumf %15, %17 : vector<256x128xf32>
      %19 = arith.truncf %18 : vector<256x128xf32> to vector<256x128xbf16>
      %c0_15 = arith.constant 0 : index
      %c0_16 = arith.constant 0 : index
      %20 = vector.load %arg6[%c0_15, %c0_16] : memref<256x128xbf16, #tpu.memory_space<vmem>>, vector<256x128xbf16>
      tpu.vector_store %arg6[%c0_15, %c0_16], %19 {strides = array<i32>} : memref<256x128xbf16, #tpu.memory_space<vmem>>, vector<256x128xbf16>,
    } else {
    }
    return
  }
  func.func @transform_0(%arg0: i32, %arg1: i32, %arg2: i32) -> (i32, i32) {
    %c0_i32 = arith.constant 0 : i32
    return %arg0, %arg2 : i32, i32
  }
  func.func @transform_1(%arg0: i32, %arg1: i32, %arg2: i32) -> (i32, i32) {
    %c0_i32 = arith.constant 0 : i32
    return %arg2, %arg1 : i32, i32
  }
  func.func @transform_2(%arg0: i32, %arg1: i32, %arg2: i32) -> (i32, i32) {
    %c0_i32 = arith.constant 0 : i32
    %c0_i32_0 = arith.constant 0 : i32
    return %c0_i32, %arg1 : i32, i32
  }
  func.func @transform_3(%arg0: i32, %arg1: i32, %arg2: i32) -> (i32, i32) {
    %c0_i32 = arith.constant 0 : i32
    return %arg0, %arg1 : i32, i32
  }
}

</mosaic_0001>

<bundles_post_ra>
// kernel: a_call__.6
= control target key start
LH: loop header
LB: loop body
LE: loop exit
PB: predicated region body
PF: predicated region fallthrough
CT: control target
= control target key end

     0   :  { %s1531_s12 = smov 0   ;;  %s1533_s13 = smov 0   ;;  %s1668_s0 = inlined_call_operand.vmem [shape: bf16[512,128], index: 0, kind: input, shape index: {}]   ;;  %s1669_s1 = inlined_call_operand.vmem [shape: bf16[128,128], index: 1, kind: input, shape index: {}]   ;;  %s1670_s2 = inlined_call_operand.vmem [shape: f32[1,128], index: 2, kind: input, shape index: {}]   ;;  %s1671_s3 = inlined_call_operand.vmem [shape: bf16[512,128], index: 3, kind: output, shape index: {}]  }
   0x1   :  { %s1535_s14 = smov 0  }
   0x2 LB: > { %s32_s15 = sadd.s32 1, %s1505_s13  ;;  %p1160_p0 = scmp.ge.s32.totalorder %s1509_s14, 1  ;;  %s1509_s14 = sphi %s1535_s14, %s13_s14   ;;  %s1505_s13 = sphi %s1533_s13, %s1673_s13   ;;  %s1501_s12 = sphi %s1531_s12, %s1672_s12  }
   0x3   : > { %p34_p1 = scmp.ge.s32.totalorder %s32_s15, 2  ;;  %p188_p2 = scmp.lt.s32.totalorder %s1509_s14, 3 }
   0x5   : > { %s1675_s15 = smov (%p34_p1, %s32_s15), 0  ;;  %p189_p3 = pnand %p1160_p0, %p188_p2 }
   0x6   : > { %v1463_v0 = vld [vmem:[%s1669_s1] sm:$0xff] (!%p189_p3)   ;;  %s1161_s18 = sshll.u32 (!%p189_p3), %s1501_s12, 5  ;;  %v1464_v1 = vld [vmem:[%s1669_s1 + $0x8] sm:$0xff] (!%p189_p3)   ;;  %v1465_v2 = vld [vmem:[%s1669_s1 + $0x10] sm:$0xff] (!%p189_p3)  }
   0x7   : > { %192 = sbr.rel (%p189_p3) target bundleno = 288 (0x120), region = 32  ;;  %p230_p4 = scmp.lt.s32.totalorder (!%p189_p3), %s1161_s18, 63  ;;  %1375 = vmatprep.subr.bf16.mxu0 (!%p189_p3), %v1463_v0  ;;  %1423 = vmatprep.subr.bf16.mxu1 (!%p189_p3), %v1463_v0  ;;  %v1466_v3 = vld [vmem:[%s1669_s1 + $0x18] sm:$0xff] (!%p189_p3)   ;;  %v1467_v6 = vld [vmem:[%s1669_s1 + $0x20] sm:$0xff] (!%p189_p3)   ;;  %v1468_v7 = vld [vmem:[%s1669_s1 + $0x28] sm:$0xff] (!%p189_p3)  }
   0x8   : > { %1376 = vmatpush3.bf16.msra.mxu0 (!%p189_p3), %v1463_v0  ;;  %1431 = vmatpush3.bf16.msra.mxu1 (!%p189_p3), %v1463_v0  ;;  %v1469_v8 = vld [vmem:[%s1669_s1 + $0x30] sm:$0xff] (!%p189_p3)   ;;  %v1470_v9 = vld [vmem:[%s1669_s1 + $0x38] sm:$0xff] (!%p189_p3)   ;;  %v1602_v24 = vld [vmem:[%s1670_s2] ss:$0 sm:$0xff] (!%p189_p3) }
   0x9   : > { %1377 = vmatprep.subr.bf16.mxu0 (!%p189_p3), %v1464_v1  ;;  %1424 = vmatprep.subr.bf16.mxu1 (!%p189_p3), %v1464_v1 }
   0xc   : > { %1378 = vmatpush3.bf16.msra.mxu0 (!%p189_p3), %v1464_v1  ;;  %1432 = vmatpush3.bf16.msra.mxu1 (!%p189_p3), %v1464_v1 }
   0xd   : > { %1379 = vmatprep.subr.bf16.mxu0 (!%p189_p3), %v1465_v2  ;;  %1425 = vmatprep.subr.bf16.mxu1 (!%p189_p3), %v1465_v2 }
   0xe   : > { %s1677_s18 = smov (!%p230_p4, %s1161_s18), 63 }
   0xf   : > { %s1162_s23 = sshll.u32 %s1677_s18, 2 }
  0x10   : > { %s1566_s26 = scalar_lea.vmem %s1668_s0, %s1162_s23  ;;  %1380 = vmatpush3.bf16.msra.mxu0 %v1465_v2  ;;  %1433 = vmatpush3.bf16.msra.mxu1 %v1465_v2  ;;  %s1617_s17 = scalar_lea.vmem %s1671_s3, %s1162_s23 }
  0x11   : > { %v1471_v4 = vld [vmem:[%s1566_s26] sm:$0xff]   ;;  %1381 = vmatprep.subr.bf16.mxu0 %v1466_v3  ;;  %1426 = vmatprep.subr.bf16.mxu1 %v1466_v3  ;;  %v1473_v10 = vld [vmem:[%s1566_s26 + $0x8] sm:$0xff]   ;;  %v1475_v12 = vld [vmem:[%s1566_s26 + $0x10] sm:$0xff]  }
  0x12   : > { %v1472_v5 = vld [vmem:[%s1566_s26 + $0x40] sm:$0xff]   ;;  %1391 = vmatprep.mubr.bf16.mxu0 %v1471_v4  ;;  %v1474_v11 = vld [vmem:[%s1566_s26 + $0x48] sm:$0xff]   ;;  %v1476_v13 = vld [vmem:[%s1566_s26 + $0x50] sm:$0xff]  }
  0x13   : > { %1407 = vmatprep.mubr.bf16.mxu1 %v1472_v5  ;;  %v1477_v14 = vld [vmem:[%s1566_s26 + $0x18] sm:$0xff]   ;;  %v1479_v16 = vld [vmem:[%s1566_s26 + $0x20] sm:$0xff]   ;;  %v1481_v18 = vld [vmem:[%s1566_s26 + $0x28] sm:$0xff]  }
  0x14   : > { %1382 = vmatpush3.bf16.msra.mxu0 %v1466_v3  ;;  %1434 = vmatpush3.bf16.msra.mxu1 %v1466_v3  ;;  %v1478_v15 = vld [vmem:[%s1566_s26 + $0x58] sm:$0xff]   ;;  %v1480_v17 = vld [vmem:[%s1566_s26 + $0x60] sm:$0xff]   ;;  %v1482_v19 = vld [vmem:[%s1566_s26 + $0x68] sm:$0xff]  }
  0x15   : > { %1383 = vmatprep.subr.bf16.mxu0 %v1467_v6  ;;  %1427 = vmatprep.subr.bf16.mxu1 %v1467_v6  ;;  %v1483_v20 = vld [vmem:[%s1566_s26 + $0x30] sm:$0xff]   ;;  %v1485_v22 = vld [vmem:[%s1566_s26 + $0x38] sm:$0xff]  }
  0x16   : > { %v1484_v21 = vld [vmem:[%s1566_s26 + $0x70] sm:$0xff]   ;;  %v1486_v23 = vld [vmem:[%s1566_s26 + $0x78] sm:$0xff]  }
  0x18   : > { %1384 = vmatpush3.bf16.msra.mxu0 %v1467_v6  ;;  %1435 = vmatpush3.bf16.msra.mxu1 %v1467_v6 }
  0x19   : > { %1385 = vmatprep.subr.bf16.mxu0 %v1468_v7  ;;  %1428 = vmatprep.subr.bf16.mxu1 %v1468_v7 }
  0x1c   : > { %1386 = vmatpush3.bf16.msra.mxu0 %v1468_v7  ;;  %1436 = vmatpush3.bf16.msra.mxu1 %v1468_v7 }
  0x1d   : > { %1387 = vmatprep.subr.bf16.mxu0 %v1469_v8  ;;  %1429 = vmatprep.subr.bf16.mxu1 %v1469_v8 }
  0x20   : > { %1388 = vmatpush3.bf16.msra.mxu0 %v1469_v8  ;;  %1437 = vmatpush3.bf16.msra.mxu1 %v1469_v8 }
  0x21   : > { %1389 = vmatprep.subr.bf16.mxu0 %v1470_v9  ;;  %1430 = vmatprep.subr.bf16.mxu1 %v1470_v9 }
  0x24   : > { %1390 = vmatpush3.bf16.msra.mxu0 %v1470_v9  ;;  %1438 = vmatpush3.bf16.msra.mxu1 %v1470_v9 }
  0x27   : > { %1392 = vmatmul.mubr.bf16.vlgmr.msra.gmra.mrb[0].mxu0 %v1473_v10  ;;  %1408 = vmatmul.mubr.bf16.vlgmr.msra.gmra.mrb[0].mxu1 %v1474_v11 }
  0x28   : > { %1395 = vmatprep.mubr.bf16.mxu0 %v1475_v12  ;;  %1411 = vmatprep.mubr.bf16.mxu1 %v1476_v13 }
  0x2f   : > { %1396 = vmatmul.mubr.bf16.gmra.mrb[4].mxu0 %v1477_v14  ;;  %1412 = vmatmul.mubr.bf16.gmra.mrb[4].mxu1 %v1478_v15 }
  0x30   : > { %1399 = vmatprep.mubr.bf16.mxu0 %v1479_v16  ;;  %1415 = vmatprep.mubr.bf16.mxu1 %v1480_v17 }
  0x37   : > { %1400 = vmatmul.mubr.bf16.gmra.mrb[8].mxu0 %v1481_v18  ;;  %1416 = vmatmul.mubr.bf16.gmra.mrb[8].mxu1 %v1482_v19 }
  0x38   : > { %1403 = vmatprep.mubr.bf16.mxu0 %v1483_v20  ;;  %1419 = vmatprep.mubr.bf16.mxu1 %v1484_v21 }
  0x3f   : > { %1404 = vmatmul.mubr.bf16.gmra.mrb[12].mxu0 %v1485_v22  ;;  %1420 = vmatmul.mubr.bf16.gmra.mrb[12].mxu1 %v1486_v23 }
  0xfa   : > { %v1393_v25 = vpop.f32.mrb[0].mxu0  ;;  %v1409_v26 = vpop.f32.mrb[0].mxu1 }
  0xfb   : > { %v789_v27 = vadd.f32 %v1393_v25, %v1602_v24  ;;  %v805_v28 = vadd.f32 %v1409_v26, %v1602_v24  ;;  %v554_v29 = vpop.f32.mrb[1].mxu0  ;;  %v618_v30 = vpop.f32.mrb[1].mxu1 }
  0xfc   : > { %v787_v31 = vadd.f32 %v1602_v24, %v554_v29  ;;  %v803_v32 = vadd.f32 %v1602_v24, %v618_v30  ;;  %v1394_v33 = vpop.f32.mrb[2].mxu0  ;;  %v1410_v34 = vpop.f32.mrb[2].mxu1 }
  0xfd   : > { %v821_v35 = vmul.f32 0.1, %v789_v27  ;;  %v837_v36 = vmul.f32 0.1, %v805_v28  ;;  %v790_v37 = vadd.f32 %v1394_v33, %v1602_v24  ;;  %v806_v38 = vadd.f32 %v1410_v34, %v1602_v24  ;;  %v557_v39 = vpop.f32.mrb[3].mxu0  ;;  %v621_v40 = vpop.f32.mrb[3].mxu1 }
  0xfe   : > { %v819_v41 = vmul.f32 0.1, %v787_v31  ;;  %v835_v42 = vmul.f32 0.1, %v803_v32  ;;  %v788_v43 = vadd.f32 %v1602_v24, %v557_v39  ;;  %v804_v44 = vadd.f32 %v1602_v24, %v621_v40 }
  0xff   : > { %v822_v45 = vmul.f32 0.1, %v790_v37  ;;  %v838_v46 = vmul.f32 0.1, %v806_v38  ;;  %v853_v49 = vmax.f32 %v789_v27, %v821_v35  ;;  %v869_v50 = vmax.f32 %v805_v28, %v837_v36 }
 0x100   : > { %v820_v47 = vmul.f32 0.1, %v788_v43  ;;  %v836_v48 = vmul.f32 0.1, %v804_v44  ;;  %v851_v53 = vmax.f32 %v787_v31, %v819_v41  ;;  %v867_v54 = vmax.f32 %v803_v32, %v835_v42 }
 0x101   : > { %v854_v51 = vmax.f32 %v790_v37, %v822_v45  ;;  %v870_v52 = vmax.f32 %v806_v38, %v838_v46 }
 0x102   : > { %v852_v55 = vmax.f32 %v788_v43, %v820_v47  ;;  %v868_v56 = vmax.f32 %v804_v44, %v836_v48  ;;  %v1397_v57 = vpop.f32.mrb[4].mxu0  ;;  %v1413_v58 = vpop.f32.mrb[4].mxu1 }
 0x103   : > { %v1264_v59 = vpack.c.bf16 %v854_v51, %v853_v49  ;;  %v1304_v60 = vpack.c.bf16 %v870_v52, %v869_v50  ;;  %v793_v61 = vadd.f32 %v1397_v57, %v1602_v24  ;;  %v809_v62 = vadd.f32 %v1413_v58, %v1602_v24  ;;  %v570_v63 = vpop.f32.mrb[5].mxu0  ;;  %v634_v0 = vpop.f32.mrb[5].mxu1 }
 0x104   : > { %v1259_v1 = vpack.c.bf16 %v852_v55, %v851_v53  ;;  %v1299_v2 = vpack.c.bf16 %v868_v56, %v867_v54  ;;  %v791_v3 = vadd.f32 %v1602_v24, %v570_v63  ;;  %v807_v4 = vadd.f32 %v1602_v24, %v634_v0  ;;  %v1398_v5 = vpop.f32.mrb[6].mxu0  ;;  %v1414_v6 = vpop.f32.mrb[6].mxu1 }
 0x105   : > { %1336 = vst [vmem:[%s1617_s17 + $0x8] sm:$0xff] %v1264_v59   ;;  %1344 = vst [vmem:[%s1617_s17 + $0x48] sm:$0xff] %v1304_v60   ;;  %v825_v7 = vmul.f32 0.1, %v793_v61  ;;  %v841_v8 = vmul.f32 0.1, %v809_v62  ;;  %v794_v9 = vadd.f32 %v1398_v5, %v1602_v24  ;;  %v810_v10 = vadd.f32 %v1414_v6, %v1602_v24 }
 0x106   : > { %v573_v11 = vpop.f32.mrb[7].mxu0  ;;  %v637_v12 = vpop.f32.mrb[7].mxu1  ;;  %1260 = vst [vmem:[%s1617_s17] sm:$0xff] %v1259_v1   ;;  %1343 = vst [vmem:[%s1617_s17 + $0x40] sm:$0xff] %v1299_v2   ;;  %v823_v13 = vmul.f32 0.1, %v791_v3 }
 0x107   : > { %v839_v14 = vmul.f32 0.1, %v807_v4  ;;  %v792_v15 = vadd.f32 %v1602_v24, %v573_v11  ;;  %v808_v16 = vadd.f32 %v1602_v24, %v637_v12  ;;  %v826_v17 = vmul.f32 0.1, %v794_v9 }
 0x108   : > { %v842_v18 = vmul.f32 0.1, %v810_v10  ;;  %v857_v21 = vmax.f32 %v793_v61, %v825_v7  ;;  %v873_v22 = vmax.f32 %v809_v62, %v841_v8  ;;  %v855_v26 = vmax.f32 %v791_v3, %v823_v13 }
 0x109   : > { %v824_v19 = vmul.f32 0.1, %v792_v15  ;;  %v840_v20 = vmul.f32 0.1, %v808_v16  ;;  %v858_v23 = vmax.f32 %v794_v9, %v826_v17  ;;  %v871_v27 = vmax.f32 %v807_v4, %v839_v14 }
 0x10a   : > { %v874_v25 = vmax.f32 %v810_v10, %v842_v18  ;;  %v1401_v30 = vpop.f32.mrb[8].mxu0  ;;  %v1417_v31 = vpop.f32.mrb[8].mxu1 }
 0x10b   : > { %v856_v28 = vmax.f32 %v792_v15, %v824_v19  ;;  %v872_v29 = vmax.f32 %v808_v16, %v840_v20  ;;  %v1274_v32 = vpack.c.bf16 %v858_v23, %v857_v21  ;;  %v797_v34 = vadd.f32 %v1401_v30, %v1602_v24  ;;  %v586_v36 = vpop.f32.mrb[9].mxu0  ;;  %v650_v37 = vpop.f32.mrb[9].mxu1 }
 0x10c   : > { %v1314_v33 = vpack.c.bf16 %v874_v25, %v873_v22  ;;  %v813_v35 = vadd.f32 %v1417_v31, %v1602_v24  ;;  %v795_v40 = vadd.f32 %v1602_v24, %v586_v36  ;;  %v811_v41 = vadd.f32 %v1602_v24, %v650_v37  ;;  %v1402_v42 = vpop.f32.mrb[10].mxu0  ;;  %v1418_v43 = vpop.f32.mrb[10].mxu1 }
 0x10d   : > { %v1269_v38 = vpack.c.bf16 %v856_v28, %v855_v26  ;;  %v1309_v39 = vpack.c.bf16 %v872_v29, %v871_v27  ;;  %1338 = vst [vmem:[%s1617_s17 + $0x18] sm:$0xff] %v1274_v32   ;;  %v829_v44 = vmul.f32 0.1, %v797_v34  ;;  %v798_v46 = vadd.f32 %v1402_v42, %v1602_v24  ;;  %v589_v48 = vpop.f32.mrb[11].mxu0  ;;  %v653_v49 = vpop.f32.mrb[11].mxu1 }
 0x10e   : > { %1346 = vst [vmem:[%s1617_s17 + $0x58] sm:$0xff] %v1314_v33   ;;  %v845_v45 = vmul.f32 0.1, %v813_v35  ;;  %v814_v47 = vadd.f32 %v1418_v43, %v1602_v24  ;;  %v827_v50 = vmul.f32 0.1, %v795_v40  ;;  %v796_v52 = vadd.f32 %v1602_v24, %v589_v48 }
 0x10f   : > { %1337 = vst [vmem:[%s1617_s17 + $0x10] sm:$0xff] %v1269_v38   ;;  %1345 = vst [vmem:[%s1617_s17 + $0x50] sm:$0xff] %v1309_v39   ;;  %v843_v51 = vmul.f32 0.1, %v811_v41  ;;  %v812_v53 = vadd.f32 %v1602_v24, %v653_v49  ;;  %v830_v54 = vmul.f32 0.1, %v798_v46  ;;  %v861_v58 = vmax.f32 %v797_v34, %v829_v44 }
 0x110   : > { %v846_v55 = vmul.f32 0.1, %v814_v47  ;;  %v828_v56 = vmul.f32 0.1, %v796_v52  ;;  %v877_v59 = vmax.f32 %v813_v35, %v845_v45  ;;  %v859_v62 = vmax.f32 %v795_v40, %v827_v50 }
 0x111   : > { %v844_v57 = vmul.f32 0.1, %v812_v53  ;;  %v862_v60 = vmax.f32 %v798_v46, %v830_v54  ;;  %v875_v63 = vmax.f32 %v811_v41, %v843_v51 }
 0x112   : > { %v878_v61 = vmax.f32 %v814_v47, %v846_v55  ;;  %v860_v0 = vmax.f32 %v796_v52, %v828_v56  ;;  %v1405_v2 = vpop.f32.mrb[12].mxu0  ;;  %v1421_v3 = vpop.f32.mrb[12].mxu1 }
 0x113   : > { %v876_v1 = vmax.f32 %v812_v53, %v844_v57  ;;  %v1284_v4 = vpack.c.bf16 %v862_v60, %v861_v58  ;;  %v801_v6 = vadd.f32 %v1405_v2, %v1602_v24  ;;  %v817_v7 = vadd.f32 %v1421_v3, %v1602_v24  ;;  %v602_v8 = vpop.f32.mrb[13].mxu0  ;;  %v666_v9 = vpop.f32.mrb[13].mxu1 }
 0x114   : > { %v1324_v5 = vpack.c.bf16 %v878_v61, %v877_v59  ;;  %v1279_v10 = vpack.c.bf16 %v860_v0, %v859_v62  ;;  %v799_v12 = vadd.f32 %v1602_v24, %v602_v8  ;;  %v815_v13 = vadd.f32 %v1602_v24, %v666_v9  ;;  %v1406_v14 = vpop.f32.mrb[14].mxu0  ;;  %v1422_v15 = vpop.f32.mrb[14].mxu1 }
 0x115   : > { %v1319_v11 = vpack.c.bf16 %v876_v1, %v875_v63  ;;  %1340 = vst [vmem:[%s1617_s17 + $0x28] sm:$0xff] %v1284_v4   ;;  %v833_v16 = vmul.f32 0.1, %v801_v6  ;;  %v849_v17 = vmul.f32 0.1, %v817_v7  ;;  %v802_v18 = vadd.f32 %v1406_v14, %v1602_v24  ;;  %v605_v20 = vpop.f32.mrb[15].mxu0 }
 0x116   : > { %1348 = vst [vmem:[%s1617_s17 + $0x68] sm:$0xff] %v1324_v5   ;;  %v818_v19 = vadd.f32 %v1422_v15, %v1602_v24  ;;  %v669_v21 = vpop.f32.mrb[15].mxu1  ;;  %1339 = vst [vmem:[%s1617_s17 + $0x20] sm:$0xff] %v1279_v10   ;;  %v831_v22 = vmul.f32 0.1, %v799_v12  ;;  %v800_v25 = vadd.f32 %v1602_v24, %v605_v20 }
 0x117   : > { %1347 = vst [vmem:[%s1617_s17 + $0x60] sm:$0xff] %v1319_v11   ;;  %v847_v23 = vmul.f32 0.1, %v815_v13  ;;  %v816_v26 = vadd.f32 %v1602_v24, %v669_v21  ;;  %v834_v27 = vmul.f32 0.1, %v802_v18  ;;  %v865_v31 = vmax.f32 %v801_v6, %v833_v16 }
 0x118   : > { %v850_v28 = vmul.f32 0.1, %v818_v19  ;;  %v832_v29 = vmul.f32 0.1, %v800_v25  ;;  %v881_v32 = vmax.f32 %v817_v7, %v849_v17  ;;  %v863_v35 = vmax.f32 %v799_v12, %v831_v22 }
 0x119   : > { %v848_v30 = vmul.f32 0.1, %v816_v26  ;;  %v866_v33 = vmax.f32 %v802_v18, %v834_v27  ;;  %v879_v36 = vmax.f32 %v815_v13, %v847_v23 }
 0x11a   : > { %v882_v34 = vmax.f32 %v818_v19, %v850_v28  ;;  %v864_v37 = vmax.f32 %v800_v25, %v832_v29 }
 0x11b   : > { %v880_v38 = vmax.f32 %v816_v26, %v848_v30  ;;  %v1294_v39 = vpack.c.bf16 %v866_v33, %v865_v31 }
 0x11c   : > { %v1334_v40 = vpack.c.bf16 %v882_v34, %v881_v32  ;;  %v1289_v41 = vpack.c.bf16 %v864_v37, %v863_v35 }
 0x11d   : > { %v1329_v24 = vpack.c.bf16 %v880_v38, %v879_v36  ;;  %1342 = vst [vmem:[%s1617_s17 + $0x38] sm:$0xff] %v1294_v39  }
 0x11e   : > { %1350 = vst [vmem:[%s1617_s17 + $0x78] sm:$0xff] %v1334_v40   ;;  %1341 = vst [vmem:[%s1617_s17 + $0x30] sm:$0xff] %v1289_v41  }
 0x11f   : > { %1349 = vst [vmem:[%s1617_s17 + $0x70] sm:$0xff] %v1329_v24  }
 0x120 PF: > { %s13_s14 = sadd.s32 1, %s1509_s14   ;;  %s1672_s12 = smov %s1505_s13 }
 0x121   : > { %p10_p5 = scmp.ge.s32.totalorder %s13_s14, 4   ;;  %s1673_s13 = smov %s1675_s15 }
 0x123   :  { %12 = sbr.rel (!%p10_p5) target bundleno = 2 (0x2), region = 76 }

</bundles_post_ra>
